<compile_context>
chip_gen: v6e
topology: v6e:2x2x1
jax: 0.10.0
libtpu: 0.0.40
codegen_flags: <defaults>
</compile_context>

<pallas_src>
import functools
from typing import NamedTuple

import jax
import jax.numpy as jnp
from jax.experimental import pallas as pl
from jax.experimental.pallas import tpu as pltpu

_MIB = 1024 * 1024


def _round_up(a: int, m: int) -> int:
    return (a + m - 1) // m * m


def _vmem_capacity_bytes() -> int:
    """Per-core VMEM capacity (64 MiB on v7x, 128 MiB on v5e/v6e)."""
    try:
        return int(pltpu.get_tpu_info().vmem_capacity_bytes)
    except Exception:
        return 128 * _MIB


def _vmem_need_bytes(tile_b, tile_n, in_p, n_layers, cd_size, out_size,
                     fuse_dot) -> int:
    """Conservative per-step VMEM footprint (assumes double buffering)."""
    x_t = tile_b * in_p * cd_size
    w_t = in_p * n_layers * tile_n * cd_size
    b_t = n_layers * tile_n * 4
    o_t = tile_b * tile_n * out_size
    # f32 intermediate held live by the kernel body.
    y_t = tile_b * (n_layers if fuse_dot else 2) * tile_n * 4
    return 2 * (x_t + w_t + b_t + o_t) + y_t


class MaxOutPacked(NamedTuple):
    w_packed: jax.Array      # (n_t, IN_p, N*tile_n)  compute dtype
    b_packed: jax.Array      # (n_t, 1,    N*tile_n)  f32
    n_layers: int
    out_features: int
    in_features: int
    in_p: int
    out_p: int
    tile_n: int
    compute_dtype: object


def pack_maxout_params(w_full, b_full, n_layers, *, compute_dtype=jnp.bfloat16,
                       tile_n=None):
    """Re-layout PyTorch Linear params for the MaxOut kernel.

    Call ONCE at parameter-load time (strided gather + pad + cast over the
    full weight); the hot forward path consumes the returned MaxOutPacked.

    w_full: (N*OUT, IN)  PyTorch Linear weight
    b_full: (N*OUT,)     PyTorch Linear bias
    """
    n_layers = int(n_layers)
    n_out_total, in_features = w_full.shape
    assert n_out_total % n_layers == 0
    out_features = n_out_total // n_layers

    in_p = _round_up(in_features, 128)
    cd = jnp.dtype(compute_dtype)
    cd_size = cd.itemsize

    cap = _vmem_capacity_bytes()
    budget = max(int(cap * 0.78) - 4 * _MIB, 8 * _MIB)
    fuse_dot = n_layers <= 2

    if tile_n is None:
        out128 = _round_up(out_features, 128)
        # Prefer 256/512-wide, lane-dense RHS tiles (v6e/v7x MXU is 256 wide);
        # pad OUT up to the tile rather than using narrow/odd widths.
        tile_n = 128
        for cand in (512, 256):
            if cand <= out128 and _vmem_need_bytes(
                    256, cand, in_p, n_layers, cd_size, 4, fuse_dot) <= budget:
                tile_n = cand
                break
    assert tile_n % 128 == 0
    out_p = _round_up(out_features, tile_n)
    n_t = out_p // tile_n

    # MaxOut group k owns Linear output columns j*N + k (MaxPool1d(N) grouping).
    w_groups = jnp.stack([w_full[k::n_layers, :].T for k in range(n_layers)],
                         axis=0)                                    # (N, IN, OUT)
    b_groups = jnp.stack([b_full[k::n_layers] for k in range(n_layers)],
                         axis=0)                                    # (N, OUT)
    w_groups = jnp.pad(w_groups, ((0, 0), (0, in_p - in_features),
                                  (0, out_p - out_features)))
    b_groups = jnp.pad(b_groups, ((0, 0), (0, out_p - out_features)))

    # Fused per-out-tile layout: columns [g0 | g1 | ... | g_{N-1}], each tile_n.
    w_packed = (w_groups.reshape(n_layers, in_p, n_t, tile_n)
                .transpose(2, 1, 0, 3)
                .reshape(n_t, in_p, n_layers * tile_n)).astype(cd)
    b_packed = (b_groups.reshape(n_layers, n_t, tile_n)
                .transpose(1, 0, 2)
                .reshape(n_t, 1, n_layers * tile_n)).astype(jnp.float32)

    w_packed = jax.block_until_ready(w_packed)
    b_packed = jax.block_until_ready(b_packed)
    return MaxOutPacked(w_packed, b_packed, n_layers, out_features,
                        in_features, in_p, out_p, tile_n, cd)


def _maxout_kernel(x_ref, w_ref, b_ref, o_ref, *, n_layers, tile_n, fuse_dot):
    # x_ref: (tile_b, IN_p)        compute dtype
    # w_ref: (1, IN_p, N*tile_n)   compute dtype
    # b_ref: (1, 1, N*tile_n)      f32
    # o_ref: (tile_b, tile_n)
    x = x_ref[...]
    if fuse_dot:
        # One wide MXU dot + cheap unrolled max over lane-aligned column slices.
        y = jnp.dot(x, w_ref[0], preferred_element_type=jnp.float32) + b_ref[0]
        acc = y[:, :tile_n]
        for k in range(1, n_layers):
            acc = jnp.maximum(acc, y[:, k * tile_n:(k + 1) * tile_n])
    else:
        # N >= 4: N narrower dots folded into a running max keeps the live f32
        # intermediate at (tile_b, tile_n) instead of (tile_b, N*tile_n).
        acc = (jnp.dot(x, w_ref[0, :, :tile_n],
                       preferred_element_type=jnp.float32)
               + b_ref[0, :, :tile_n])
        for k in range(1, n_layers):
            sl = slice(k * tile_n, (k + 1) * tile_n)
            acc = jnp.maximum(
                acc,
                jnp.dot(x, w_ref[0, :, sl],
                        preferred_element_type=jnp.float32) + b_ref[0, :, sl])
    o_ref[...] = acc.astype(o_ref.dtype)


def maxout_forward(x, packed: MaxOutPacked, *, tile_b=None):
    """Hot-path MaxOut forward: x (B, IN) -> (B, OUT) in x.dtype."""
    B, in_features = x.shape
    assert in_features == packed.in_features
    N = packed.n_layers
    tile_n = packed.tile_n
    in_p, out_pad = packed.in_p, packed.out_p
    n_t = out_pad // tile_n
    cd = packed.compute_dtype
    cd_size = jnp.dtype(cd).itemsize
    out_dtype = x.dtype
    out_size = jnp.dtype(out_dtype).itemsize
    fuse_dot = N <= 2

    cap = _vmem_capacity_bytes()
    is_v7x_class = cap <= 96 * _MIB                 # 64 MiB/TC generation
    budget = max(int(cap * 0.78) - 4 * _MIB, 8 * _MIB)

    # ---- batch tiling: multiple of 16 (bf16 sublane min), VMEM-budgeted ----
    if tile_b is None:
        tile_b_cap = 256 if is_v7x_class else 512
        tile_b = min(_round_up(B, 16), tile_b_cap)
        while (tile_b > 16 and
               _vmem_need_bytes(tile_b, tile_n, in_p, N, cd_size, out_size,
                                fuse_dot) > budget):
            tile_b = max(16, _round_up(tile_b // 2, 16))
    min_sublane = 16 if cd_size < 4 else 8
    assert tile_b % min_sublane == 0
    B_p = _round_up(B, tile_b)
    n_bt = B_p // tile_b

    x_p = jnp.pad(x, ((0, B_p - B), (0, in_p - in_features))).astype(cd)

    # ---- grid order: minimize redundant HBM traffic ----
    x_bytes = B_p * in_p * cd_size
    w_bytes = packed.w_packed.size * cd_size + packed.b_packed.size * 4
    o_bytes = B_p * out_pad * out_size
    out_major = n_t * x_bytes + w_bytes <= x_bytes + n_bt * w_bytes

    if out_major:
        grid = (n_t, n_bt)
        x_map = lambda j, i: (i, 0)
        w_map = lambda j, i: (j, 0, 0)
        o_map = lambda j, i: (i, j)
        reuse_weights = True            # weight block constant over inner axis
        bytes_accessed = n_t * x_bytes + w_bytes + o_bytes
        outer_size = n_t
    else:
        grid = (n_bt, n_t)
        x_map = lambda i, j: (i, 0)
        w_map = lambda i, j: (j, 0, 0)
        o_map = lambda i, j: (i, j)
        reuse_weights = False           # x block constant over inner axis
        bytes_accessed = x_bytes + n_bt * w_bytes + o_bytes
        outer_size = n_bt

    need = _vmem_need_bytes(tile_b, tile_n, in_p, N, cd_size, out_size, fuse_dot)
    vmem_limit = int(min(cap * 0.82, max(32 * _MIB, need + 4 * _MIB)))

    cost = pl.CostEstimate(
        flops=2 * B_p * in_p * N * out_pad,
        transcendentals=0,
        bytes_accessed=int(bytes_accessed),
    )
    kernel = functools.partial(_maxout_kernel, n_layers=N, tile_n=tile_n,
                               fuse_dot=fuse_dot)

    def _spec(shape, index_map, single_buffer):
        if single_buffer:
            return pl.BlockSpec(shape, index_map, pipeline_mode=pl.Buffered(1))
        return pl.BlockSpec(shape, index_map)

    def _run(fast):
        if fast and is_v7x_class and outer_size >= 2:
            # Engage v7x's second TensorCore on the outer grid axis.
            sems = (pltpu.CORE_PARALLEL, pltpu.PARALLEL)
        else:
            sems = ("parallel", "parallel")
        return pl.pallas_call(
            kernel,
            out_shape=jax.ShapeDtypeStruct((B_p, out_pad), out_dtype),
            grid_spec=pltpu.PrefetchScalarGridSpec(
                num_scalar_prefetch=0,
                grid=grid,
                in_specs=[
                    _spec((tile_b, in_p), x_map, fast and not reuse_weights),
                    _spec((1, in_p, N * tile_n), w_map, fast and reuse_weights),
                    _spec((1, 1, N * tile_n), w_map, fast and reuse_weights),
                ],
                out_specs=pl.BlockSpec((tile_b, tile_n), o_map),
            ),
            compiler_params=pltpu.CompilerParams(
                dimension_semantics=sems,
                vmem_limit_bytes=vmem_limit,
            ),
            cost_estimate=cost,
        )(x_p, packed.w_packed, packed.b_packed)

    try:
        out_full = _run(True)
    except Exception:
        # Fall back to the plain, previously-validated double-buffered config.
        out_full = _run(False)

    return out_full[:B, :packed.out_features]


def maxout_pallas(x, w_full, b_full, n_layers, **pack_kwargs):
    """One-shot convenience wrapper (packs every call). In real use, pack once
    with pack_maxout_params() and call maxout_forward() on the hot path."""
    return maxout_forward(x, pack_maxout_params(w_full, b_full, n_layers,
                                                **pack_kwargs))


def maxout_reference(x, w_full, b_full, n_layers):
    """Plain-JAX reference matching PyTorch MaxOut exactly (f32)."""
    y = x @ w_full.T + b_full[None, :]              # (B, N*out)
    out_features = w_full.shape[0] // n_layers
    return jnp.max(y.reshape(x.shape[0], out_features, n_layers), axis=-1)


if __name__ == "__main__":
    key = jax.random.PRNGKey(0)

    B = 8
    IN_FEATURES = 32
    OUT_FEATURES = 16
    N_LAYERS = 2

    k_x, k_w, k_b = jax.random.split(key, 3)
    x = jax.random.normal(k_x, (B, IN_FEATURES), dtype=jnp.float32)

    # Deterministic "Linear" parameters: weight (N*out, in), bias (N*out,)
    bound = 1.0 / (IN_FEATURES ** 0.5)
    w_full = jax.random.uniform(
        k_w, (N_LAYERS * OUT_FEATURES, IN_FEATURES),
        minval=-bound, maxval=bound, dtype=jnp.float32)
    b_full = jax.random.uniform(
        k_b, (N_LAYERS * OUT_FEATURES,),
        minval=-bound, maxval=bound, dtype=jnp.float32)

    # Pack ONCE (parameter-load time), then run the hot forward path.
    packed = pack_maxout_params(w_full, b_full, N_LAYERS)
    out = maxout_forward(x, packed)
    out = jax.block_until_ready(out)

    ref = maxout_reference(x, w_full, b_full, N_LAYERS)
    assert out.shape == (B, OUT_FEATURES)
    # bf16 operands with f32 MXU accumulation -> loosened tolerance vs f32 ref.
    assert jnp.allclose(out, ref, atol=2e-2, rtol=2e-2), (
        f"max abs err {jnp.max(jnp.abs(out - ref))}")

    print("KERNEL_OK")
</pallas_src>

<mosaic_0001>
module attributes {stable_mosaic.version = 11 : i64} {
  func.func @_maxout_kernel(%arg0: i32, %arg1: i32, %arg2: memref<16x128xbf16, #tpu.memory_space<vmem>>, %arg3: memref<1x128x256xbf16, #tpu.memory_space<vmem>>, %arg4: memref<1x1x256xf32, #tpu.memory_space<vmem>>, %arg5: memref<16x128xf32, #tpu.memory_space<vmem>>) attributes {dimension_semantics = [#tpu.dimension_semantics<parallel>, #tpu.dimension_semantics<parallel>], iteration_bounds = array<i64: 1, 1>, scalar_prefetch = 0 : i64, scratch_operands = 0 : i64, tpu.core_type = #tpu.core_type<tc>, window_params = [{transform_indices = @transform_0, window_bounds = array<i64: 16, 128>}, {pipeline_mode = #tpu.pipeline_mode<synchronous>, transform_indices = @transform_1, window_bounds = array<i64: 1, 128, 256>}, {pipeline_mode = #tpu.pipeline_mode<synchronous>, transform_indices = @transform_2, window_bounds = array<i64: 1, 1, 256>}, {transform_indices = @transform_3, window_bounds = array<i64: 16, 128>}]} {
    %c0 = arith.constant 0 : index
    %c0_0 = arith.constant 0 : index
    %0 = vector.load %arg2[%c0, %c0_0] : memref<16x128xbf16, #tpu.memory_space<vmem>>, vector<16x128xbf16>
    %c0_1 = arith.constant 0 : index
    %c0_2 = arith.constant 0 : index
    %c0_3 = arith.constant 0 : index
    %1 = vector.load %arg3[%c0_1, %c0_2, %c0_3] : memref<1x128x256xbf16, #tpu.memory_space<vmem>>, vector<1x128x256xbf16>
    %2 = vector.shape_cast %1 : vector<1x128x256xbf16> to vector<128x256xbf16>
    %cst = arith.constant dense<0.000000e+00> : vector<16x256xf32>
    %3 = tpu.matmul %0, %2, %cst {dimension_numbers = #tpu.dot_dimension_numbers<[1], [0], [0], [1], [0, 0, 1, 1], [], []>} : vector<16x128xbf16>, vector<128x256xbf16>, vector<16x256xf32> -> vector<16x256xf32>
    %c0_4 = arith.constant 0 : index
    %c0_5 = arith.constant 0 : index
    %c0_6 = arith.constant 0 : index
    %4 = vector.load %arg4[%c0_4, %c0_5, %c0_6] : memref<1x1x256xf32, #tpu.memory_space<vmem>>, vector<1x1x256xf32>
    %5 = vector.shape_cast %4 : vector<1x1x256xf32> to vector<1x256xf32>
    %6 = vector.broadcast %5 : vector<1x256xf32> to vector<16x256xf32>
    %7 = arith.addf %3, %6 : vector<16x256xf32>
    %8 = vector.extract_strided_slice %7 {offsets = [0, 0], sizes = [16, 128], strides = [1, 1]} : vector<16x256xf32> to vector<16x128xf32>
    %9 = vector.extract_strided_slice %7 {offsets = [0, 128], sizes = [16, 128], strides = [1, 1]} : vector<16x256xf32> to vector<16x128xf32>
    %10 = arith.maximumf %8, %9 : vector<16x128xf32>
    %c0_7 = arith.constant 0 : index
    %c0_8 = arith.constant 0 : index
    %11 = vector.load %arg5[%c0_7, %c0_8] : memref<16x128xf32, #tpu.memory_space<vmem>>, vector<16x128xf32>
    tpu.vector_store %arg5[%c0_7, %c0_8], %10 {strides = array<i32>} : memref<16x128xf32, #tpu.memory_space<vmem>>, vector<16x128xf32>,
    return
  }
  func.func @transform_0(%arg0: i32, %arg1: i32) -> (i32, i32) {
    %c0_i32 = arith.constant 0 : i32
    %c0_i32_0 = arith.constant 0 : i32
    return %arg1, %c0_i32 : i32, i32
  }
  func.func @transform_1(%arg0: i32, %arg1: i32) -> (i32, i32, i32) {
    %c0_i32 = arith.constant 0 : i32
    %c0_i32_0 = arith.constant 0 : i32
    %c0_i32_1 = arith.constant 0 : i32
    return %arg0, %c0_i32, %c0_i32_0 : i32, i32, i32
  }
  func.func @transform_2(%arg0: i32, %arg1: i32) -> (i32, i32, i32) {
    %c0_i32 = arith.constant 0 : i32
    %c0_i32_0 = arith.constant 0 : i32
    %c0_i32_1 = arith.constant 0 : i32
    return %arg0, %c0_i32, %c0_i32_0 : i32, i32, i32
  }
  func.func @transform_3(%arg0: i32, %arg1: i32) -> (i32, i32) {
    %c0_i32 = arith.constant 0 : i32
    return %arg1, %arg0 : i32, i32
  }
}

module attributes {stable_mosaic.version = 11 : i64} {
  func.func @_maxout_kernel(%arg0: i32, %arg1: i32, %arg2: memref<16x128xbf16, #tpu.memory_space<vmem>>, %arg3: memref<1x128x256xbf16, #tpu.memory_space<vmem>>, %arg4: memref<1x1x256xf32, #tpu.memory_space<vmem>>, %arg5: memref<16x128xf32, #tpu.memory_space<vmem>>) attributes {dimension_semantics = [#tpu.dimension_semantics<parallel>, #tpu.dimension_semantics<parallel>], iteration_bounds = array<i64: 1, 1>, scalar_prefetch = 0 : i64, scratch_operands = 0 : i64, tpu.core_type = #tpu.core_type<tc>, window_params = [{transform_indices = @transform_0, window_bounds = array<i64: 16, 128>}, {transform_indices = @transform_1, window_bounds = array<i64: 1, 128, 256>}, {transform_indices = @transform_2, window_bounds = array<i64: 1, 1, 256>}, {transform_indices = @transform_3, window_bounds = array<i64: 16, 128>}]} {
    %c0 = arith.constant 0 : index
    %c0_0 = arith.constant 0 : index
    %0 = vector.load %arg2[%c0, %c0_0] : memref<16x128xbf16, #tpu.memory_space<vmem>>, vector<16x128xbf16>
    %c0_1 = arith.constant 0 : index
    %c0_2 = arith.constant 0 : index
    %c0_3 = arith.constant 0 : index
    %1 = vector.load %arg3[%c0_1, %c0_2, %c0_3] : memref<1x128x256xbf16, #tpu.memory_space<vmem>>, vector<1x128x256xbf16>
    %2 = vector.shape_cast %1 : vector<1x128x256xbf16> to vector<128x256xbf16>
    %cst = arith.constant dense<0.000000e+00> : vector<16x256xf32>
    %3 = tpu.matmul %0, %2, %cst {dimension_numbers = #tpu.dot_dimension_numbers<[1], [0], [0], [1], [0, 0, 1, 1], [], []>} : vector<16x128xbf16>, vector<128x256xbf16>, vector<16x256xf32> -> vector<16x256xf32>
    %c0_4 = arith.constant 0 : index
    %c0_5 = arith.constant 0 : index
    %c0_6 = arith.constant 0 : index
    %4 = vector.load %arg4[%c0_4, %c0_5, %c0_6] : memref<1x1x256xf32, #tpu.memory_space<vmem>>, vector<1x1x256xf32>
    %5 = vector.shape_cast %4 : vector<1x1x256xf32> to vector<1x256xf32>
    %6 = vector.broadcast %5 : vector<1x256xf32> to vector<16x256xf32>
    %7 = arith.addf %3, %6 : vector<16x256xf32>
    %8 = vector.extract_strided_slice %7 {offsets = [0, 0], sizes = [16, 128], strides = [1, 1]} : vector<16x256xf32> to vector<16x128xf32>
    %9 = vector.extract_strided_slice %7 {offsets = [0, 128], sizes = [16, 128], strides = [1, 1]} : vector<16x256xf32> to vector<16x128xf32>
    %10 = arith.maximumf %8, %9 : vector<16x128xf32>
    %c0_7 = arith.constant 0 : index
    %c0_8 = arith.constant 0 : index
    %11 = vector.load %arg5[%c0_7, %c0_8] : memref<16x128xf32, #tpu.memory_space<vmem>>, vector<16x128xf32>
    tpu.vector_store %arg5[%c0_7, %c0_8], %10 {strides = array<i32>} : memref<16x128xf32, #tpu.memory_space<vmem>>, vector<16x128xf32>,
    return
  }
  func.func @transform_0(%arg0: i32, %arg1: i32) -> (i32, i32) {
    %c0_i32 = arith.constant 0 : i32
    %c0_i32_0 = arith.constant 0 : i32
    return %arg1, %c0_i32 : i32, i32
  }
  func.func @transform_1(%arg0: i32, %arg1: i32) -> (i32, i32, i32) {
    %c0_i32 = arith.constant 0 : i32
    %c0_i32_0 = arith.constant 0 : i32
    %c0_i32_1 = arith.constant 0 : i32
    return %arg0, %c0_i32, %c0_i32_0 : i32, i32, i32
  }
  func.func @transform_2(%arg0: i32, %arg1: i32) -> (i32, i32, i32) {
    %c0_i32 = arith.constant 0 : i32
    %c0_i32_0 = arith.constant 0 : i32
    %c0_i32_1 = arith.constant 0 : i32
    return %arg0, %c0_i32, %c0_i32_0 : i32, i32, i32
  }
  func.func @transform_3(%arg0: i32, %arg1: i32) -> (i32, i32) {
    %c0_i32 = arith.constant 0 : i32
    return %arg1, %arg0 : i32, i32
  }
}

</mosaic_0001>

<bundles_post_ra>
// kernel: tpu_custom_call.1
= control target key start
LH: loop header
LB: loop body
LE: loop exit
PB: predicated region body
PF: predicated region fallthrough
CT: control target
= control target key end

     0   :  { %8 = vsyncpa [#allocation3], 0  ;;  %s387_s0 = inlined_call_operand.hbm [shape: bf16[16,128], index: 0, kind: input, shape index: {}]   ;;  %s388_s1 = inlined_call_operand.hbm [shape: bf16[1,128,256], index: 1, kind: input, shape index: {}]   ;;  %s389_s2 = inlined_call_operand.vmem [shape: f32[1,1,256], index: 2, kind: input, shape index: {}]   ;;  %s390_s3 = inlined_call_operand.hbm [shape: f32[16,128], index: 3, kind: output, shape index: {}]  }
   0x1   :  { %9 = vsyncpa [#allocation6], 0 }
   0x2   :  { %10 = vsyncpa [#allocation4], 0  ;;  %s341_s12 = smov [#allocation2]  }
   0x3   :  { %s16_s13 = sshll.u32 %s341_s12, 4  ;;  %s17_s13 = int_to_ptr.vmem [resolvable:$true] %s16_s13 }
   0x4   :  { %s283_s14 = scalar_lea.vmem %s17_s13, 128  ;;  %p288_p1 = scmp.lt.s32.totalorder %s17_s13, %s17_s13 }
   0x5   :  { %p284_p0 = scmp.ne.s32.totalorder %s17_s13, %s283_s14  ;;  %p289_p2 = scmp.lt.s32.totalorder %s283_s14, %s283_s14 }
   0x7   :  { %p290_p3 = por %p289_p2, %p288_p1 }
   0x9   :  { %p291_p4 = pnand %p290_p3, %p284_p0 }
   0xb   :  { %294 = shalt.err (!%p291_p4)
}
   0xc   :  { %s342_s15 = smov 64   ;;  %s343_s16 = smov 4  }
   0xd   :  { %22 = dma.hbm_to_vmem [thread:$0]  %s387_s0, 128, %s17_s13, [#allocation3], %s342_s15, %s342_s15, %s343_s16  }
   0xe   :  { %s344_s19 = smov [#allocation5]  }
   0xf   :  { %s28_s20 = sshll.u32 %s344_s19, 4  ;;  %s29_s20 = int_to_ptr.vmem [resolvable:$true] %s28_s20 }
  0x10   :  { %s303_s21 = scalar_lea.vmem %s29_s20, 2048  ;;  %p308_p6 = scmp.lt.s32.totalorder %s29_s20, %s29_s20 }
  0x11   :  { %p304_p5 = scmp.ne.s32.totalorder %s29_s20, %s303_s21  ;;  %p309_p7 = scmp.lt.s32.totalorder %s303_s21, %s303_s21 }
  0x13   :  { %p310_p8 = por %p309_p7, %p308_p6 }
  0x15   :  { %p311_p9 = pnand %p310_p8, %p304_p5 }
  0x17   :  { %314 = shalt.err (!%p311_p9)
}
  0x18   :  { %s345_s22 = smov 128   ;;  %s346_s23 = smov 8  }
  0x19   :  { %34 = dma.hbm_to_vmem [thread:$0]  %s388_s1, 2048, %s29_s20, [#allocation6], %s345_s22, %s345_s22, %s346_s23  }
  0x1a   :  { %335 = dma.done.wait [#allocation3], 128  }
  0x1b   :  { %336 = vsyncadd [#allocation3], 4294967168 }
  0x1c   :  { %337 = dma.done.wait [#allocation6], 2048  }
  0x1d   :  { %338 = vsyncadd [#allocation6], 4294965248  ;;  %v347_v0 = vmov 0   ;;  %v250_v1 = vld [vmem:[#allocation5 + $0x74] ss:$8 sps:$4 sm:$0xff]   ;;  %v64_v18 = vlaneseq  ;;  %s348_s26 = smov [#allocation7]  }
  0x1e   :  { %192 = vmatprep.mubr.bf16.mxu0 %v347_v0  ;;  %v252_v2 = vld [vmem:[#allocation5 + $0x70] ss:$8 sps:$4 sm:$0xff]   ;;  %160 = vmatprep.subr.bf16.mxu0 %v250_v1  ;;  %v253_v3 = vld [vmem:[#allocation5 + $0x64] ss:$8 sps:$4 sm:$0xff]   ;;  %v255_v4 = vld [vmem:[#allocation5 + $0x60] ss:$8 sps:$4 sm:$0xff]  }
  0x1f   :  { %161 = vmatpush1.bf16.msra.mxu0 %v252_v2  ;;  %v256_v5 = vld [vmem:[#allocation5 + $0x54] ss:$8 sps:$4 sm:$0xff]   ;;  %v258_v6 = vld [vmem:[#allocation5 + $0x50] ss:$8 sps:$4 sm:$0xff]   ;;  %v259_v7 = vld [vmem:[#allocation5 + $0x44] ss:$8 sps:$4 sm:$0xff]  }
  0x20   :  { %162 = vmatprep.subr.bf16.mxu0 %v253_v3  ;;  %v261_v8 = vld [vmem:[#allocation5 + $0x40] ss:$8 sps:$4 sm:$0xff]   ;;  %v262_v9 = vld [vmem:[#allocation5 + $0x34] ss:$8 sps:$4 sm:$0xff]   ;;  %v264_v10 = vld [vmem:[#allocation5 + $0x30] ss:$8 sps:$4 sm:$0xff]  }
  0x21   :  { %v265_v11 = vld [vmem:[#allocation5 + $0x24] ss:$8 sps:$4 sm:$0xff]   ;;  %v267_v12 = vld [vmem:[#allocation5 + $0x20] ss:$8 sps:$4 sm:$0xff]   ;;  %v268_v13 = vld [vmem:[#allocation5 + $0x14] ss:$8 sps:$4 sm:$0xff]  }
  0x22   :  { %v270_v14 = vld [vmem:[#allocation5 + $0x10] ss:$8 sps:$4 sm:$0xff]   ;;  %v271_v15 = vld [vmem:[#allocation5 + $0x4] ss:$8 sps:$4 sm:$0xff]   ;;  %v273_v16 = vld [vmem:[#allocation5] ss:$8 sps:$4 sm:$0xff]  }
  0x23   :  { %163 = vmatpush1.bf16.msra.mxu0 %v255_v4  ;;  %v274_v17 = vld [vmem:[#allocation2] sm:$0xff]   ;;  %v65_v19 = vshrl.u32 %v64_v18, 7  ;;  %s212_s27 = sshll.u32 %s348_s26, 4  ;;  %s213_s27 = int_to_ptr.vmem [resolvable:$true] %s212_s27 }
  0x24   :  { %164 = vmatprep.subr.bf16.mxu0 %v256_v5  ;;  %v62_v22 = vld [vmem:[%s389_s2] sm:$0x3]  ;;  %s315_s28 = scalar_lea.vmem %s213_s27, 256  ;;  %p320_p11 = scmp.lt.s32.totalorder %s213_s27, %s213_s27 }
  0x25   :  { %v66_v20 = vsub.s32 0, %v65_v19  ;;  %v70_v21 = vsub.s32 1, %v65_v19  ;;  %p316_p10 = scmp.ne.s32.totalorder %s213_s27, %s315_s28  ;;  %p321_p12 = scmp.lt.s32.totalorder %s315_s28, %s315_s28 }
  0x27   :  { %165 = vmatpush1.bf16.msra.mxu0 %v258_v6  ;;  %v67_v23 = vrot.slane %v62_v22, %v66_v20  ;;  %v71_v24 = vrot.slane %v62_v22, %v70_v21  ;;  %p322_p13 = por %p321_p12, %p320_p11 }
  0x28   :  { %166 = vmatprep.subr.bf16.mxu0 %v259_v7 }
  0x29   :  { %p323_p0 = pnand %p322_p13, %p316_p10 }
  0x2b   :  { %167 = vmatpush1.bf16.msra.mxu0 %v261_v8 }
  0x2c   :  { %168 = vmatprep.subr.bf16.mxu0 %v262_v9 }
  0x2f   :  { %169 = vmatpush1.bf16.msra.mxu0 %v264_v10 }
  0x30   :  { %170 = vmatprep.subr.bf16.mxu0 %v265_v11 }
  0x33   :  { %171 = vmatpush1.bf16.msra.mxu0 %v267_v12 }
  0x34   :  { %172 = vmatprep.subr.bf16.mxu0 %v268_v13 }
  0x37   :  { %173 = vmatpush1.bf16.msra.mxu0 %v270_v14 }
  0x38   :  { %174 = vmatprep.subr.bf16.mxu0 %v271_v15 }
  0x3b   :  { %175 = vmatpush1.bf16.msra.mxu0 %v273_v16 }
  0x3e   :  { %193 = vmatmul.mubr.bf16.vlgmr.msra.gmra.mxu0 %v274_v17 }
  0xfe   :  { %v194_v25 = vpop.f32.mrf.mxu0 }
  0xff   :  { %v195_v27 = vadd.f32 %v194_v25, %v67_v23 }
 0x100   :  { %v196_v26 = vpop.f32.mrf.mxu0 }
 0x101   :  { %v197_v28 = vadd.f32 %v196_v26, %v71_v24 }
 0x102   :  { %v198_v29 = vpop.f32.mrf.mxu0 }
 0x103   :  { %v203_v30 = vmax.f32 %v195_v27, %v197_v28  ;;  %v199_v32 = vadd.f32 %v198_v29, %v67_v23 }
 0x104   :  { %v200_v31 = vpop.f32.mrf.mxu0 }
 0x105   :  { %205 = vst [vmem:[#allocation7] sm:$0xff] %v203_v30  ;;  %v201_v33 = vadd.f32 %v200_v31, %v71_v24 }
 0x107   :  { %v204_v34 = vmax.f32 %v199_v32, %v201_v33 }
 0x109   :  { %206 = vst [vmem:[#allocation7 + $0x8] sm:$0xff] %v204_v34 }
 0x10a   :  { %326 = shalt.err (!%p323_p0)
}
 0x10b   :  { %218 = dma.vmem_to_hbm [thread:$0]  %s213_s27, 256, %s390_s3, [#allocation4], %s345_s22, %s345_s22, %s346_s23  }
 0x10c   :  { %339 = dma.done.wait [#allocation4], 256  }
 0x10d   :  { %340 = vsyncadd [#allocation4], 4294967040 }
 0x10e   :  { %222 = vsyncpa [#allocation3], 1 }
 0x10f   :  { %223 = vsyncpa [#allocation6], 1 }
 0x110   :  { %224 = vsyncpa [#allocation4], 1 }

// kernel: tpu_custom_call.1
= control target key start
LH: loop header
LB: loop body
LE: loop exit
PB: predicated region body
PF: predicated region fallthrough
CT: control target
= control target key end

     0   :  { %8 = vsyncpa [#allocation3], 0  ;;  %s387_s0 = inlined_call_operand.hbm [shape: bf16[16,128], index: 0, kind: input, shape index: {}]   ;;  %s388_s1 = inlined_call_operand.hbm [shape: bf16[1,128,256], index: 1, kind: input, shape index: {}]   ;;  %s389_s2 = inlined_call_operand.vmem [shape: f32[1,1,256], index: 2, kind: input, shape index: {}]   ;;  %s390_s3 = inlined_call_operand.hbm [shape: f32[16,128], index: 3, kind: output, shape index: {}]  }
   0x1   :  { %9 = vsyncpa [#allocation6], 0 }
   0x2   :  { %10 = vsyncpa [#allocation4], 0  ;;  %s341_s12 = smov [#allocation2]  }
   0x3   :  { %s16_s13 = sshll.u32 %s341_s12, 4  ;;  %s17_s13 = int_to_ptr.vmem [resolvable:$true] %s16_s13 }
   0x4   :  { %s283_s14 = scalar_lea.vmem %s17_s13, 128  ;;  %p288_p1 = scmp.lt.s32.totalorder %s17_s13, %s17_s13 }
   0x5   :  { %p284_p0 = scmp.ne.s32.totalorder %s17_s13, %s283_s14  ;;  %p289_p2 = scmp.lt.s32.totalorder %s283_s14, %s283_s14 }
   0x7   :  { %p290_p3 = por %p289_p2, %p288_p1 }
   0x9   :  { %p291_p4 = pnand %p290_p3, %p284_p0 }
   0xb   :  { %294 = shalt.err (!%p291_p4)
}
   0xc   :  { %s342_s15 = smov 64   ;;  %s343_s16 = smov 4  }
   0xd   :  { %22 = dma.hbm_to_vmem [thread:$0]  %s387_s0, 128, %s17_s13, [#allocation3], %s342_s15, %s342_s15, %s343_s16  }
   0xe   :  { %s344_s19 = smov [#allocation5]  }
   0xf   :  { %s28_s20 = sshll.u32 %s344_s19, 4  ;;  %s29_s20 = int_to_ptr.vmem [resolvable:$true] %s28_s20 }
  0x10   :  { %s303_s21 = scalar_lea.vmem %s29_s20, 2048  ;;  %p308_p6 = scmp.lt.s32.totalorder %s29_s20, %s29_s20 }
  0x11   :  { %p304_p5 = scmp.ne.s32.totalorder %s29_s20, %s303_s21  ;;  %p309_p7 = scmp.lt.s32.totalorder %s303_s21, %s303_s21 }
  0x13   :  { %p310_p8 = por %p309_p7, %p308_p6 }
  0x15   :  { %p311_p9 = pnand %p310_p8, %p304_p5 }
  0x17   :  { %314 = shalt.err (!%p311_p9)
}
  0x18   :  { %s345_s22 = smov 128   ;;  %s346_s23 = smov 8  }
  0x19   :  { %34 = dma.hbm_to_vmem [thread:$0]  %s388_s1, 2048, %s29_s20, [#allocation6], %s345_s22, %s345_s22, %s346_s23  }
  0x1a   :  { %335 = dma.done.wait [#allocation3], 128  }
  0x1b   :  { %336 = vsyncadd [#allocation3], 4294967168 }
  0x1c   :  { %337 = dma.done.wait [#allocation6], 2048  }
  0x1d   :  { %338 = vsyncadd [#allocation6], 4294965248  ;;  %v347_v0 = vmov 0   ;;  %v250_v1 = vld [vmem:[#allocation5 + $0x74] ss:$8 sps:$4 sm:$0xff]   ;;  %v64_v18 = vlaneseq  ;;  %s348_s26 = smov [#allocation7]  }
  0x1e   :  { %192 = vmatprep.mubr.bf16.mxu0 %v347_v0  ;;  %v252_v2 = vld [vmem:[#allocation5 + $0x70] ss:$8 sps:$4 sm:$0xff]   ;;  %160 = vmatprep.subr.bf16.mxu0 %v250_v1  ;;  %v253_v3 = vld [vmem:[#allocation5 + $0x64] ss:$8 sps:$4 sm:$0xff]   ;;  %v255_v4 = vld [vmem:[#allocation5 + $0x60] ss:$8 sps:$4 sm:$0xff]  }
  0x1f   :  { %161 = vmatpush1.bf16.msra.mxu0 %v252_v2  ;;  %v256_v5 = vld [vmem:[#allocation5 + $0x54] ss:$8 sps:$4 sm:$0xff]   ;;  %v258_v6 = vld [vmem:[#allocation5 + $0x50] ss:$8 sps:$4 sm:$0xff]   ;;  %v259_v7 = vld [vmem:[#allocation5 + $0x44] ss:$8 sps:$4 sm:$0xff]  }
  0x20   :  { %162 = vmatprep.subr.bf16.mxu0 %v253_v3  ;;  %v261_v8 = vld [vmem:[#allocation5 + $0x40] ss:$8 sps:$4 sm:$0xff]   ;;  %v262_v9 = vld [vmem:[#allocation5 + $0x34] ss:$8 sps:$4 sm:$0xff]   ;;  %v264_v10 = vld [vmem:[#allocation5 + $0x30] ss:$8 sps:$4 sm:$0xff]  }
  0x21   :  { %v265_v11 = vld [vmem:[#allocation5 + $0x24] ss:$8 sps:$4 sm:$0xff]   ;;  %v267_v12 = vld [vmem:[#allocation5 + $0x20] ss:$8 sps:$4 sm:$0xff]   ;;  %v268_v13 = vld [vmem:[#allocation5 + $0x14] ss:$8 sps:$4 sm:$0xff]  }
  0x22   :  { %v270_v14 = vld [vmem:[#allocation5 + $0x10] ss:$8 sps:$4 sm:$0xff]   ;;  %v271_v15 = vld [vmem:[#allocation5 + $0x4] ss:$8 sps:$4 sm:$0xff]   ;;  %v273_v16 = vld [vmem:[#allocation5] ss:$8 sps:$4 sm:$0xff]  }
  0x23   :  { %163 = vmatpush1.bf16.msra.mxu0 %v255_v4  ;;  %v274_v17 = vld [vmem:[#allocation2] sm:$0xff]   ;;  %v65_v19 = vshrl.u32 %v64_v18, 7  ;;  %s212_s27 = sshll.u32 %s348_s26, 4  ;;  %s213_s27 = int_to_ptr.vmem [resolvable:$true] %s212_s27 }
  0x24   :  { %164 = vmatprep.subr.bf16.mxu0 %v256_v5  ;;  %v62_v22 = vld [vmem:[%s389_s2] sm:$0x3]  ;;  %s315_s28 = scalar_lea.vmem %s213_s27, 256  ;;  %p320_p11 = scmp.lt.s32.totalorder %s213_s27, %s213_s27 }
  0x25   :  { %v66_v20 = vsub.s32 0, %v65_v19  ;;  %v70_v21 = vsub.s32 1, %v65_v19  ;;  %p316_p10 = scmp.ne.s32.totalorder %s213_s27, %s315_s28  ;;  %p321_p12 = scmp.lt.s32.totalorder %s315_s28, %s315_s28 }
  0x27   :  { %165 = vmatpush1.bf16.msra.mxu0 %v258_v6  ;;  %v67_v23 = vrot.slane %v62_v22, %v66_v20  ;;  %v71_v24 = vrot.slane %v62_v22, %v70_v21  ;;  %p322_p13 = por %p321_p12, %p320_p11 }
  0x28   :  { %166 = vmatprep.subr.bf16.mxu0 %v259_v7 }
  0x29   :  { %p323_p0 = pnand %p322_p13, %p316_p10 }
  0x2b   :  { %167 = vmatpush1.bf16.msra.mxu0 %v261_v8 }
  0x2c   :  { %168 = vmatprep.subr.bf16.mxu0 %v262_v9 }
  0x2f   :  { %169 = vmatpush1.bf16.msra.mxu0 %v264_v10 }
  0x30   :  { %170 = vmatprep.subr.bf16.mxu0 %v265_v11 }
  0x33   :  { %171 = vmatpush1.bf16.msra.mxu0 %v267_v12 }
  0x34   :  { %172 = vmatprep.subr.bf16.mxu0 %v268_v13 }
  0x37   :  { %173 = vmatpush1.bf16.msra.mxu0 %v270_v14 }
  0x38   :  { %174 = vmatprep.subr.bf16.mxu0 %v271_v15 }
  0x3b   :  { %175 = vmatpush1.bf16.msra.mxu0 %v273_v16 }
  0x3e   :  { %193 = vmatmul.mubr.bf16.vlgmr.msra.gmra.mxu0 %v274_v17 }
  0xfe   :  { %v194_v25 = vpop.f32.mrf.mxu0 }
  0xff   :  { %v195_v27 = vadd.f32 %v194_v25, %v67_v23 }
 0x100   :  { %v196_v26 = vpop.f32.mrf.mxu0 }
 0x101   :  { %v197_v28 = vadd.f32 %v196_v26, %v71_v24 }
 0x102   :  { %v198_v29 = vpop.f32.mrf.mxu0 }
 0x103   :  { %v203_v30 = vmax.f32 %v195_v27, %v197_v28  ;;  %v199_v32 = vadd.f32 %v198_v29, %v67_v23 }
 0x104   :  { %v200_v31 = vpop.f32.mrf.mxu0 }
 0x105   :  { %205 = vst [vmem:[#allocation7] sm:$0xff] %v203_v30  ;;  %v201_v33 = vadd.f32 %v200_v31, %v71_v24 }
 0x107   :  { %v204_v34 = vmax.f32 %v199_v32, %v201_v33 }
 0x109   :  { %206 = vst [vmem:[#allocation7 + $0x8] sm:$0xff] %v204_v34 }
 0x10a   :  { %326 = shalt.err (!%p323_p0)
}
 0x10b   :  { %218 = dma.vmem_to_hbm [thread:$0]  %s213_s27, 256, %s390_s3, [#allocation4], %s345_s22, %s345_s22, %s346_s23  }
 0x10c   :  { %339 = dma.done.wait [#allocation4], 256  }
 0x10d   :  { %340 = vsyncadd [#allocation4], 4294967040 }
 0x10e   :  { %222 = vsyncpa [#allocation3], 1 }
 0x10f   :  { %223 = vsyncpa [#allocation6], 1 }
 0x110   :  { %224 = vsyncpa [#allocation4], 1 }

</bundles_post_ra>
